<compile_context>
chip_gen: v7x
topology: tpu7x:2x2x1
jax: 0.10.0
libtpu: 0.0.40
codegen_flags: <defaults>
</compile_context>

<pallas_src>
import numpy as np
import jax
import jax.numpy as jnp
from jax.experimental import pallas as pl
from jax.experimental.pallas import tpu as pltpu


def _round_up(x, m):
    return ((x + m - 1) // m) * m


# ----------------------------------------------------------------------------
# Pallas kernel: grid = (B, N_tiles); one (TN, .) row-tile per step.
# ----------------------------------------------------------------------------
def _make_kernel(N, TN):
    """Closure over static N (true point count) and TN (row tile)."""

    def kernel(pts_ref, w1, b1, w2, b2, w3, b3, w4, b4, w5, b5, out_ref):
        n = pl.program_id(1)

        # Output block is resident across the (arbitrary) N axis: init once.
        # Post-ReLU activations are >= 0, so 0 is a correct identity for the max.
        @pl.when(n == 0)
        def _():
            out_ref[...] = jnp.zeros_like(out_ref)

        x = pts_ref[0]                                        # (TN, 8) f32; ch 0..2 real

        # Layer 1 (K=3): VPU broadcast MACs instead of a padded MXU pass.
        h = (x[:, 0:1] * w1[0:1, :]
             + x[:, 1:2] * w1[1:2, :]
             + x[:, 2:3] * w1[2:3, :]) + b1[...]
        h = jnp.maximum(h, 0.0)                               # (TN, 64) f32

        def layer(h, w_ref, b_ref):
            # bf16 MXU matmul, f32 accumulation; bias + ReLU epilogue in f32.
            y = jnp.dot(h.astype(jnp.bfloat16), w_ref[...],
                        preferred_element_type=jnp.float32)
            return jnp.maximum(y + b_ref[...], 0.0)

        h = layer(h, w2, b2)                                  # (TN, 64)
        h = layer(h, w3, b3)                                  # (TN, 64)
        h = layer(h, w4, b4)                                  # (TN, 128)
        h = layer(h, w5, b5)                                  # (TN, dim_k)

        if N % TN != 0:
            # Padded rows carry relu(bias) which may be > 0; clamp them to 0.
            # (True per-channel max is >= 0 post-ReLU, so 0 can never raise it.)
            row = n * TN + jax.lax.broadcasted_iota(jnp.int32, (TN, 1), 0)
            h = jnp.where(row < N, h, 0.0)

        tile_max = jnp.max(h, axis=0, keepdims=True)          # (1, dim_k)
        out_ref[0] = jnp.maximum(out_ref[0], tile_max)

    return kernel


# ----------------------------------------------------------------------------
# Wrapper: layout packing, dtype casts, pallas_call.
# ----------------------------------------------------------------------------
def pointnet_forward(points, params, *, tile_n=1024):
    """points: (B, N, 3).  params: [(W (C_in, C_out) f32, b (1, C_out) f32)] x 5."""
    B, N, C = points.shape
    assert C == 3
    dim_k = params[-1][0].shape[1]

    # Row tile: biggest that fits comfortably (v7x 64 MiB VMEM: keep TN <= ~4096).
    TN = min(int(tile_n), _round_up(N, 8))
    n_tiles = (N + TN - 1) // TN
    N_pad = n_tiles * TN

    # Channels-last input with channel padded 3 -> 8; rows padded to a tile multiple.
    pts = jnp.zeros((B, N_pad, 8), jnp.float32)
    pts = pts.at[:, :N, :3].set(points.astype(jnp.float32))

    (w1, b1) = params[0]
    args = [pts, w1.astype(jnp.float32), b1.astype(jnp.float32)]
    in_specs = [
        pl.BlockSpec((1, TN, 8), lambda b, n: (b, n, 0)),
        pl.BlockSpec(w1.shape, lambda b, n: (0, 0)),
        pl.BlockSpec(b1.shape, lambda b, n: (0, 0)),
    ]
    # Layers 2..5: bf16 weights for the MXU, f32 biases for the epilogue.
    for w, bias in params[1:]:
        args.append(w.astype(jnp.bfloat16))
        args.append(bias.astype(jnp.float32))
        in_specs.append(pl.BlockSpec(w.shape, lambda b, n: (0, 0)))
        in_specs.append(pl.BlockSpec(bias.shape, lambda b, n: (0, 0)))

    flops = 2 * B * N * sum(int(w.shape[0]) * int(w.shape[1]) for w, _ in params)
    bytes_accessed = (int(pts.size) * 4
                      + sum(int(w.size) * (4 if i == 0 else 2) + int(b.size) * 4
                            for i, (w, b) in enumerate(params))
                      + B * dim_k * 4)

    out = pl.pallas_call(
        _make_kernel(N, TN),
        out_shape=jax.ShapeDtypeStruct((B, 1, dim_k), jnp.float32),
        grid=(B, n_tiles),
        in_specs=in_specs,
        out_specs=pl.BlockSpec((1, 1, dim_k), lambda b, n: (b, 0, 0)),
        compiler_params=pltpu.CompilerParams(
            dimension_semantics=("parallel", "arbitrary")),
        cost_estimate=pl.CostEstimate(
            flops=flops, transcendentals=0, bytes_accessed=bytes_accessed),
    )(*args)
    return out.reshape(B, dim_k)                              # flatten(symfn_max(x))


# ----------------------------------------------------------------------------
# Deterministic parameter construction (Conv1d(k=1) + BatchNorm1d folded, eval mode).
# ----------------------------------------------------------------------------
def make_params(key, channels):
    """channels e.g. [3, 64, 64, 64, 128, dim_k] -> [(W (C_in,C_out), b (1,C_out))]."""
    params = []
    eps = 1e-5
    for i in range(len(channels) - 1):
        c_in, c_out = channels[i], channels[i + 1]
        key, kw, kb, kg, kbt, km, kv = jax.random.split(key, 7)
        bound = 1.0 / np.sqrt(c_in)
        w = jax.random.uniform(kw, (c_in, c_out), jnp.float32, -bound, bound)
        bias = jax.random.uniform(kb, (c_out,), jnp.float32, -bound, bound)
        gamma = 1.0 + 0.1 * jax.random.normal(kg, (c_out,), jnp.float32)
        beta = 0.1 * jax.random.normal(kbt, (c_out,), jnp.float32)
        mean = 0.1 * jax.random.normal(km, (c_out,), jnp.float32)
        var = jnp.abs(1.0 + 0.1 * jax.random.normal(kv, (c_out,), jnp.float32))
        scale = gamma / jnp.sqrt(var + eps)
        params.append((w * scale[None, :], ((bias - mean) * scale + beta)[None, :]))
    return params


def ref_forward(points, params):
    """Pure-JAX reference using the same compute dtypes as the kernel."""
    x = points.astype(jnp.float32)                            # (B, N, 3)
    w1, b1 = params[0]
    h = (x[..., 0:1] * w1[0] + x[..., 1:2] * w1[1] + x[..., 2:3] * w1[2]) + b1
    h = jnp.maximum(h, 0.0)
    for w, b in params[1:]:
        y = jnp.einsum('bnc,cd->bnd',
                       h.astype(jnp.bfloat16), w.astype(jnp.bfloat16),
                       preferred_element_type=jnp.float32)
        h = jnp.maximum(y + b, 0.0)
    return jnp.max(h, axis=1)                                 # (B, dim_k)


if __name__ == "__main__":
    key = jax.random.PRNGKey(0)
    dim_k = 128                                               # small, multiple of 128
    channels = [3, 64, 64, 64, 128, dim_k]

    # Test 1: N a multiple of the row tile (single N tile per batch).
    B, N = 2, 64
    key, kp = jax.random.split(key)
    points = jax.random.normal(kp, (B, N, 3), jnp.float32)
    params = make_params(key, channels)
    out = jax.block_until_ready(pointnet_forward(points, params))
    ref = jax.block_until_ready(ref_forward(points, params))
    assert out.shape == (B, dim_k)
    np.testing.assert_allclose(np.asarray(out), np.asarray(ref),
                               rtol=1e-3, atol=1e-3)

    # Test 2: N not a multiple of the row tile (exercises the running-max over
    # multiple N tiles and the padded-row mask).
    B2, N2 = 2, 72
    key, kp2 = jax.random.split(key)
    points2 = jax.random.normal(kp2, (B2, N2, 3), jnp.float32)
    out2 = jax.block_until_ready(pointnet_forward(points2, params, tile_n=64))
    ref2 = jax.block_until_ready(ref_forward(points2, params))
    assert out2.shape == (B2, dim_k)
    np.testing.assert_allclose(np.asarray(out2), np.asarray(ref2),
                               rtol=1e-3, atol=1e-3)

    print("KERNEL_OK")
</pallas_src>

<mosaic_0001>
module attributes {stable_mosaic.version = 11 : i64} {
  func.func @kernel(%arg0: i32, %arg1: i32, %arg2: memref<1x64x8xf32, #tpu.memory_space<vmem>>, %arg3: memref<3x64xf32, #tpu.memory_space<vmem>>, %arg4: memref<1x64xf32, #tpu.memory_space<vmem>>, %arg5: memref<64x64xbf16, #tpu.memory_space<vmem>>, %arg6: memref<1x64xf32, #tpu.memory_space<vmem>>, %arg7: memref<64x64xbf16, #tpu.memory_space<vmem>>, %arg8: memref<1x64xf32, #tpu.memory_space<vmem>>, %arg9: memref<64x128xbf16, #tpu.memory_space<vmem>>, %arg10: memref<1x128xf32, #tpu.memory_space<vmem>>, %arg11: memref<128x128xbf16, #tpu.memory_space<vmem>>, %arg12: memref<1x128xf32, #tpu.memory_space<vmem>>, %arg13: memref<1x1x128xf32, #tpu.memory_space<vmem>>) attributes {dimension_semantics = [#tpu.dimension_semantics<parallel>, #tpu.dimension_semantics<arbitrary>], iteration_bounds = array<i64: 2, 1>, scalar_prefetch = 0 : i64, scratch_operands = 0 : i64, tpu.core_type = #tpu.core_type<tc>, window_params = [{transform_indices = @transform_0, window_bounds = array<i64: 1, 64, 8>}, {pipeline_mode = #tpu.pipeline_mode<synchronous>, transform_indices = @transform_1, window_bounds = array<i64: 3, 64>}, {pipeline_mode = #tpu.pipeline_mode<synchronous>, transform_indices = @transform_2, window_bounds = array<i64: 1, 64>}, {pipeline_mode = #tpu.pipeline_mode<synchronous>, transform_indices = @transform_3, window_bounds = array<i64: 64, 64>}, {pipeline_mode = #tpu.pipeline_mode<synchronous>, transform_indices = @transform_4, window_bounds = array<i64: 1, 64>}, {pipeline_mode = #tpu.pipeline_mode<synchronous>, transform_indices = @transform_5, window_bounds = array<i64: 64, 64>}, {pipeline_mode = #tpu.pipeline_mode<synchronous>, transform_indices = @transform_6, window_bounds = array<i64: 1, 64>}, {pipeline_mode = #tpu.pipeline_mode<synchronous>, transform_indices = @transform_7, window_bounds = array<i64: 64, 128>}, {pipeline_mode = #tpu.pipeline_mode<synchronous>, transform_indices = @transform_8, window_bounds = array<i64: 1, 128>}, {pipeline_mode = #tpu.pipeline_mode<synchronous>, transform_indices = @transform_9, window_bounds = array<i64: 128, 128>}, {pipeline_mode = #tpu.pipeline_mode<synchronous>, transform_indices = @transform_10, window_bounds = array<i64: 1, 128>}, {transform_indices = @transform_11, window_bounds = array<i64: 1, 1, 128>}]} {
    %c0_i32 = arith.constant 0 : i32
    %0 = arith.cmpi eq, %arg1, %c0_i32 : i32
    %1 = arith.extui %0 : i1 to i32
    %c0_i32_0 = arith.constant 0 : i32
    %2 = arith.cmpi ne, %1, %c0_i32_0 : i32
    scf.if %2 {
      %cst_40 = arith.constant 0.000000e+00 : f32
      %67 = vector.broadcast %cst_40 : f32 to vector<1x1x128xf32>
      %c0_41 = arith.constant 0 : index
      %c0_42 = arith.constant 0 : index
      %c0_43 = arith.constant 0 : index
      %68 = vector.load %arg13[%c0_41, %c0_42, %c0_43] : memref<1x1x128xf32, #tpu.memory_space<vmem>>, vector<1x1x128xf32>
      tpu.vector_store %arg13[%c0_41, %c0_42, %c0_43], %67 {strides = array<i32>} : memref<1x1x128xf32, #tpu.memory_space<vmem>>, vector<1x1x128xf32>,
    } else {
    }
    %c0 = arith.constant 0 : index
    %c0_1 = arith.constant 0 : index
    %c0_2 = arith.constant 0 : index
    %3 = vector.load %arg2[%c0, %c0_1, %c0_2] : memref<1x64x8xf32, #tpu.memory_space<vmem>>, vector<1x64x8xf32>
    %4 = vector.shape_cast %3 : vector<1x64x8xf32> to vector<64x8xf32>
    %5 = vector.extract_strided_slice %4 {offsets = [0, 0], sizes = [64, 1], strides = [1, 1]} : vector<64x8xf32> to vector<64x1xf32>
    %c0_3 = arith.constant 0 : index
    %c0_4 = arith.constant 0 : index
    %6 = vector.load %arg3[%c0_3, %c0_4] : memref<3x64xf32, #tpu.memory_space<vmem>>, vector<1x64xf32>
    %7 = vector.broadcast %5 : vector<64x1xf32> to vector<64x64xf32>
    %8 = vector.broadcast %6 : vector<1x64xf32> to vector<64x64xf32>
    %9 = arith.mulf %7, %8 : vector<64x64xf32>
    %10 = vector.extract_strided_slice %4 {offsets = [0, 1], sizes = [64, 1], strides = [1, 1]} : vector<64x8xf32> to vector<64x1xf32>
    %c1 = arith.constant 1 : index
    %c0_5 = arith.constant 0 : index
    %11 = vector.load %arg3[%c1, %c0_5] : memref<3x64xf32, #tpu.memory_space<vmem>>, vector<1x64xf32>
    %12 = vector.broadcast %10 : vector<64x1xf32> to vector<64x64xf32>
    %13 = vector.broadcast %11 : vector<1x64xf32> to vector<64x64xf32>
    %14 = arith.mulf %12, %13 : vector<64x64xf32>
    %15 = arith.addf %9, %14 : vector<64x64xf32>
    %16 = vector.extract_strided_slice %4 {offsets = [0, 2], sizes = [64, 1], strides = [1, 1]} : vector<64x8xf32> to vector<64x1xf32>
    %c2 = arith.constant 2 : index
    %c0_6 = arith.constant 0 : index
    %17 = vector.load %arg3[%c2, %c0_6] : memref<3x64xf32, #tpu.memory_space<vmem>>, vector<1x64xf32>
    %18 = vector.broadcast %16 : vector<64x1xf32> to vector<64x64xf32>
    %19 = vector.broadcast %17 : vector<1x64xf32> to vector<64x64xf32>
    %20 = arith.mulf %18, %19 : vector<64x64xf32>
    %21 = arith.addf %15, %20 : vector<64x64xf32>
    %c0_7 = arith.constant 0 : index
    %c0_8 = arith.constant 0 : index
    %22 = vector.load %arg4[%c0_7, %c0_8] : memref<1x64xf32, #tpu.memory_space<vmem>>, vector<1x64xf32>
    %23 = vector.broadcast %22 : vector<1x64xf32> to vector<64x64xf32>
    %24 = arith.addf %21, %23 : vector<64x64xf32>
    %cst = arith.constant 0.000000e+00 : f32
    %25 = vector.broadcast %cst : f32 to vector<64x64xf32>
    %26 = arith.maximumf %24, %25 : vector<64x64xf32>
    %27 = arith.truncf %26 : vector<64x64xf32> to vector<64x64xbf16>
    %c0_9 = arith.constant 0 : index
    %c0_10 = arith.constant 0 : index
    %28 = vector.load %arg5[%c0_9, %c0_10] : memref<64x64xbf16, #tpu.memory_space<vmem>>, vector<64x64xbf16>
    %cst_11 = arith.constant dense<0.000000e+00> : vector<64x64xf32>
    %29 = tpu.matmul %27, %28, %cst_11 {dimension_numbers = #tpu.dot_dimension_numbers<[1], [0], [0], [1], [0, 0, 1, 1], [], []>} : vector<64x64xbf16>, vector<64x64xbf16>, vector<64x64xf32> -> vector<64x64xf32>
    %c0_12 = arith.constant 0 : index
    %c0_13 = arith.constant 0 : index
    %30 = vector.load %arg6[%c0_12, %c0_13] : memref<1x64xf32, #tpu.memory_space<vmem>>, vector<1x64xf32>
    %31 = vector.broadcast %30 : vector<1x64xf32> to vector<64x64xf32>
    %32 = arith.addf %29, %31 : vector<64x64xf32>
    %cst_14 = arith.constant 0.000000e+00 : f32
    %33 = vector.broadcast %cst_14 : f32 to vector<64x64xf32>
    %34 = arith.maximumf %32, %33 : vector<64x64xf32>
    %35 = arith.truncf %34 : vector<64x64xf32> to vector<64x64xbf16>
    %c0_15 = arith.constant 0 : index
    %c0_16 = arith.constant 0 : index
    %36 = vector.load %arg7[%c0_15, %c0_16] : memref<64x64xbf16, #tpu.memory_space<vmem>>, vector<64x64xbf16>
    %cst_17 = arith.constant dense<0.000000e+00> : vector<64x64xf32>
    %37 = tpu.matmul %35, %36, %cst_17 {dimension_numbers = #tpu.dot_dimension_numbers<[1], [0], [0], [1], [0, 0, 1, 1], [], []>} : vector<64x64xbf16>, vector<64x64xbf16>, vector<64x64xf32> -> vector<64x64xf32>
    %c0_18 = arith.constant 0 : index
    %c0_19 = arith.constant 0 : index
    %38 = vector.load %arg8[%c0_18, %c0_19] : memref<1x64xf32, #tpu.memory_space<vmem>>, vector<1x64xf32>
    %39 = vector.broadcast %38 : vector<1x64xf32> to vector<64x64xf32>
    %40 = arith.addf %37, %39 : vector<64x64xf32>
    %cst_20 = arith.constant 0.000000e+00 : f32
    %41 = vector.broadcast %cst_20 : f32 to vector<64x64xf32>
    %42 = arith.maximumf %40, %41 : vector<64x64xf32>
    %43 = arith.truncf %42 : vector<64x64xf32> to vector<64x64xbf16>
    %c0_21 = arith.constant 0 : index
    %c0_22 = arith.constant 0 : index
    %44 = vector.load %arg9[%c0_21, %c0_22] : memref<64x128xbf16, #tpu.memory_space<vmem>>, vector<64x128xbf16>
    %cst_23 = arith.constant dense<0.000000e+00> : vector<64x128xf32>
    %45 = tpu.matmul %43, %44, %cst_23 {dimension_numbers = #tpu.dot_dimension_numbers<[1], [0], [0], [1], [0, 0, 1, 1], [], []>} : vector<64x64xbf16>, vector<64x128xbf16>, vector<64x128xf32> -> vector<64x128xf32>
    %c0_24 = arith.constant 0 : index
    %c0_25 = arith.constant 0 : index
    %46 = vector.load %arg10[%c0_24, %c0_25] : memref<1x128xf32, #tpu.memory_space<vmem>>, vector<1x128xf32>
    %47 = vector.broadcast %46 : vector<1x128xf32> to vector<64x128xf32>
    %48 = arith.addf %45, %47 : vector<64x128xf32>
    %cst_26 = arith.constant 0.000000e+00 : f32
    %49 = vector.broadcast %cst_26 : f32 to vector<64x128xf32>
    %50 = arith.maximumf %48, %49 : vector<64x128xf32>
    %51 = arith.truncf %50 : vector<64x128xf32> to vector<64x128xbf16>
    %c0_27 = arith.constant 0 : index
    %c0_28 = arith.constant 0 : index
    %52 = vector.load %arg11[%c0_27, %c0_28] : memref<128x128xbf16, #tpu.memory_space<vmem>>, vector<128x128xbf16>
    %cst_29 = arith.constant dense<0.000000e+00> : vector<64x128xf32>
    %53 = tpu.matmul %51, %52, %cst_29 {dimension_numbers = #tpu.dot_dimension_numbers<[1], [0], [0], [1], [0, 0, 1, 1], [], []>} : vector<64x128xbf16>, vector<128x128xbf16>, vector<64x128xf32> -> vector<64x128xf32>
    %c0_30 = arith.constant 0 : index
    %c0_31 = arith.constant 0 : index
    %54 = vector.load %arg12[%c0_30, %c0_31] : memref<1x128xf32, #tpu.memory_space<vmem>>, vector<1x128xf32>
    %55 = vector.broadcast %54 : vector<1x128xf32> to vector<64x128xf32>
    %56 = arith.addf %53, %55 : vector<64x128xf32>
    %cst_32 = arith.constant 0.000000e+00 : f32
    %57 = vector.broadcast %cst_32 : f32 to vector<64x128xf32>
    %58 = arith.maximumf %56, %57 : vector<64x128xf32>
    %cst_33 = arith.constant dense<0xFF800000> : vector<128xf32>
    %59 = vector.multi_reduction <maximumf>, %58, %cst_33 [0] : vector<64x128xf32> to vector<128xf32>
    %60 = vector.shape_cast %59 : vector<128xf32> to vector<1x128xf32>
    %c0_34 = arith.constant 0 : index
    %c0_35 = arith.constant 0 : index
    %c0_36 = arith.constant 0 : index
    %61 = vector.load %arg13[%c0_34, %c0_35, %c0_36] : memref<1x1x128xf32, #tpu.memory_space<vmem>>, vector<1x1x128xf32>
    %62 = vector.shape_cast %61 : vector<1x1x128xf32> to vector<1x128xf32>
    %63 = arith.maximumf %62, %60 : vector<1x128xf32>
    %c0_37 = arith.constant 0 : index
    %c0_38 = arith.constant 0 : index
    %c0_39 = arith.constant 0 : index
    %64 = vector.load %arg13[%c0_37, %c0_38, %c0_39] : memref<1x1x128xf32, #tpu.memory_space<vmem>>, vector<1x1x128xf32>
    %65 = vector.shape_cast %64 : vector<1x1x128xf32> to vector<1x128xf32>
    %66 = vector.shape_cast %63 : vector<1x128xf32> to vector<1x1x128xf32>
    tpu.vector_store %arg13[%c0_37, %c0_38, %c0_39], %66 {strides = array<i32>} : memref<1x1x128xf32, #tpu.memory_space<vmem>>, vector<1x1x128xf32>,
    return
  }
  func.func @transform_0(%arg0: i32, %arg1: i32) -> (i32, i32, i32) {
    %c0_i32 = arith.constant 0 : i32
    %c0_i32_0 = arith.constant 0 : i32
    return %arg0, %arg1, %c0_i32 : i32, i32, i32
  }
  func.func @transform_1(%arg0: i32, %arg1: i32) -> (i32, i32) {
    %c0_i32 = arith.constant 0 : i32
    %c0_i32_0 = arith.constant 0 : i32
    %c0_i32_1 = arith.constant 0 : i32
    return %c0_i32, %c0_i32_0 : i32, i32
  }
  func.func @transform_2(%arg0: i32, %arg1: i32) -> (i32, i32) {
    %c0_i32 = arith.constant 0 : i32
    %c0_i32_0 = arith.constant 0 : i32
    %c0_i32_1 = arith.constant 0 : i32
    return %c0_i32, %c0_i32_0 : i32, i32
  }
  func.func @transform_3(%arg0: i32, %arg1: i32) -> (i32, i32) {
    %c0_i32 = arith.constant 0 : i32
    %c0_i32_0 = arith.constant 0 : i32
    %c0_i32_1 = arith.constant 0 : i32
    return %c0_i32, %c0_i32_0 : i32, i32
  }
  func.func @transform_4(%arg0: i32, %arg1: i32) -> (i32, i32) {
    %c0_i32 = arith.constant 0 : i32
    %c0_i32_0 = arith.constant 0 : i32
    %c0_i32_1 = arith.constant 0 : i32
    return %c0_i32, %c0_i32_0 : i32, i32
  }
  func.func @transform_5(%arg0: i32, %arg1: i32) -> (i32, i32) {
    %c0_i32 = arith.constant 0 : i32
    %c0_i32_0 = arith.constant 0 : i32
    %c0_i32_1 = arith.constant 0 : i32
    return %c0_i32, %c0_i32_0 : i32, i32
  }
  func.func @transform_6(%arg0: i32, %arg1: i32) -> (i32, i32) {
    %c0_i32 = arith.constant 0 : i32
    %c0_i32_0 = arith.constant 0 : i32
    %c0_i32_1 = arith.constant 0 : i32
    return %c0_i32, %c0_i32_0 : i32, i32
  }
  func.func @transform_7(%arg0: i32, %arg1: i32) -> (i32, i32) {
    %c0_i32 = arith.constant 0 : i32
    %c0_i32_0 = arith.constant 0 : i32
    %c0_i32_1 = arith.constant 0 : i32
    return %c0_i32, %c0_i32_0 : i32, i32
  }
  func.func @transform_8(%arg0: i32, %arg1: i32) -> (i32, i32) {
    %c0_i32 = arith.constant 0 : i32
    %c0_i32_0 = arith.constant 0 : i32
    %c0_i32_1 = arith.constant 0 : i32
    return %c0_i32, %c0_i32_0 : i32, i32
  }
  func.func @transform_9(%arg0: i32, %arg1: i32) -> (i32, i32) {
    %c0_i32 = arith.constant 0 : i32
    %c0_i32_0 = arith.constant 0 : i32
    %c0_i32_1 = arith.constant 0 : i32
    return %c0_i32, %c0_i32_0 : i32, i32
  }
  func.func @transform_10(%arg0: i32, %arg1: i32) -> (i32, i32) {
    %c0_i32 = arith.constant 0 : i32
    %c0_i32_0 = arith.constant 0 : i32
    %c0_i32_1 = arith.constant 0 : i32
    return %c0_i32, %c0_i32_0 : i32, i32
  }
  func.func @transform_11(%arg0: i32, %arg1: i32) -> (i32, i32, i32) {
    %c0_i32 = arith.constant 0 : i32
    %c0_i32_0 = arith.constant 0 : i32
    %c0_i32_1 = arith.constant 0 : i32
    return %arg0, %c0_i32, %c0_i32_0 : i32, i32, i32
  }
}

</mosaic_0001>

<bundles_post_ra>
// kernel: tpu_custom_call.1
= control target key start
LH: loop header
LB: loop body
LE: loop exit
PB: predicated region body
PF: predicated region fallthrough
CT: control target
= control target key end

     0   :  { %16 = vsyncpa [#allocation3], 0  ;;  %s2004_s0 = inlined_call_operand.vmem [shape: f32[2,64,8], index: 0, kind: input, shape index: {}]   ;;  %s2005_s1 = inlined_call_operand.hbm [shape: f32[3,64], index: 1, kind: input, shape index: {}]   ;;  %s2006_s2 = inlined_call_operand.vmem [shape: f32[1,64], index: 2, kind: input, shape index: {}]   ;;  %s2007_s3 = inlined_call_operand.vmem [shape: bf16[64,64], index: 3, kind: input, shape index: {}]   ;;  %s2008_s4 = inlined_call_operand.vmem [shape: f32[1,64], index: 4, kind: input, shape index: {}]   ;;  %s2009_s5 = inlined_call_operand.vmem [shape: bf16[64,64], index: 5, kind: input, shape index: {}]   ;;  %s2010_s6 = inlined_call_operand.vmem [shape: f32[1,64], index: 6, kind: input, shape index: {}]   ;;  %s2011_s7 = inlined_call_operand.vmem [shape: bf16[64,128], index: 7, kind: input, shape index: {}]   ;;  %s2012_s8 = inlined_call_operand.vmem [shape: f32[1,128], index: 8, kind: input, shape index: {}]   ;;  %s2013_s9 = inlined_call_operand.vmem [shape: bf16[128,128], index: 9, kind: input, shape index: {}]   ;;  %s2014_s10 = inlined_call_operand.vmem [shape: f32[1,128], index: 10, kind: input, shape index: {}]   ;;  %s2015_s11 = inlined_call_operand.hbm [shape: f32[2,1,128], index: 11, kind: output, shape index: {}]  }
   0x1   :  { %17 = vsyncpa [#allocation4], 0 }
   0x2   :  { %19 = vsyncpa [#allocation4 + $0x1], 0  ;;  %s1707_s17 = smov 0   ;;  %s1709_s18 = smov 0  }
   0x3   :  { %s1711_s19 = smov 0   ;;  %s1713_s20 = smov 0  }
   0x4   :  { %s1715_s21 = smov 0   ;;  %s1717_s22 = smov 0  }
   0x5 LB: > { %2022 = sst [smem:[#allocation8_spill]] %s1635_s21  ;;  %s1264_s23 = sadd.s32 4294967295, %s1639_s22   ;;  %s1639_s22 = sphi %s1717_s22, %s25_s22   ;;  %s1635_s21 = sphi %s1715_s21, %s2036_s21   ;;  %s1631_s20 = sphi %s1713_s20, %s2035_s20   ;;  %s1627_s19 = sphi %s1711_s19, %s2039_s19   ;;  %s1623_s18 = sphi %s1709_s18, %s2038_s18   ;;  %s1619_s17 = sphi %s1707_s17, %s2037_s17  }
   0x6   : > { %s1265_s24 = sadd.s32 4294967294, %s1639_s22   ;;  %s37_s25 = sadd.s32 1, %s1635_s21 }
   0x7   : > { %s282_s26 = sadd.s32 1, %s1627_s19  ;;  %p39_p0 = scmp.ge.s32.totalorder %s37_s25, 2 }
   0x8   : > { %p292_p1 = scmp.ne.s32.totalorder %s1627_s19, %s1623_s18  ;;  %p293_p2 = scmp.eq.s32.totalorder %s1264_s23, 1 }
   0x9   : > { %p298_p3 = scmp.ne.s32.totalorder %s1623_s18, %s1619_s17  ;;  %s2041_s25 = smov (%p39_p0, %s37_s25), 0 }
   0xa   : > { %2023 = sst [smem:[#allocation9_spill]] %s2041_s25  ;;  %p1747_p4 = por %p293_p2, %p292_p1 }
   0xb   : > { %p299_p5 = scmp.eq.s32.totalorder %s1265_s24, 1  ;;  %s279_s28 = ssub.s32 %s1635_s21, %s2041_s25 }
   0xc   : > { %s2024_s27 = scalar_select %p1747_p4, 1, 0 }
   0xd   : > { %p1266_p6 = scmp.ge.s32.totalorder %s1639_s22, 1  ;;  %p280_p7 = scmp.eq.s32.totalorder %s279_s28, 0 }
   0xe   : > { %p1754_p8 = por %p299_p5, %p298_p3  ;;  %p306_p9 = scmp.lt.s32.totalorder %s1639_s22, 3 }
   0xf   : > { %s1760_s30 = scalar_select %p280_p7, %s1627_s19, %s282_s26  }
  0x10   : > { %s2025_s29 = scalar_select %p1754_p8, 1, 0 }
  0x11   : > { %2026 = sst [smem:[#allocation10_spill]] %s1760_s30  ;;  %p1762_p10 = pnand %p1266_p6, %p306_p9 }
  0x12   : > { %p1766_p11 = scmp.eq.s32.totalorder %s1264_s23, 0  ;;  %s1641_s14 = smov [#allocation2]  }
  0x13   : > { %s2027_s12 = scalar_select %p1762_p10, 1, 0 }
  0x14   : > { %s2028_s13 = scalar_select %p1766_p11, 1, 0 }
  0x15   : > { %p1431_p12 = pneg %p1762_p10  ;;  %s319_s15 = sshll.u32 %s1641_s14, 4  ;;  %s320_s15 = int_to_ptr.vmem [resolvable:$true] %s319_s15 }
  0x16   : > { %s1529_s28 = scalar_lea.hbm %s2005_s1, 64 }
  0x17   : > { %p1774_p13 = pnand %p1766_p11, %p1431_p12  ;;  %p1530_p0 = scmp.ne.s32.totalorder %s2005_s1, %s1529_s28 }
  0x18   : > { %p1536_p5 = scmp.lt.u32.totalorder %s1529_s28, %s2005_s1 }
  0x19   : > { %p1531_p1 = pneg %p1774_p13 }
  0x1b   : > { %p1532_p2 = pnand %p1531_p1, %p1530_p0 }
  0x1d   : > { %p1533_p3 = pneg %p1532_p2 }
  0x1f   : > { %p1538_p6 = pnand %p1536_p5, %p1533_p3 }
  0x21   : > { %1541 = shalt.err (!%p1538_p6)
}
  0x22   : > { %s1542_s30 = scalar_lea.vmem %s320_s15, 64  ;;  %p1550_p8 = scmp.lt.s32.totalorder %s320_s15, %s320_s15 }
  0x23   : > { %p1543_p7 = scmp.ne.s32.totalorder %s320_s15, %s1542_s30  ;;  %p1551_p4 = scmp.lt.s32.totalorder %s1542_s30, %s1542_s30 }
  0x25   : > { %p1545_p9 = pnand %p1543_p7, %p1531_p1  ;;  %p1552_p11 = por %p1551_p4, %p1550_p8 }
  0x27   : > { %p1546_p12 = pneg %p1545_p9 }
  0x29   : > { %p1553_p10 = pnand %p1552_p11, %p1546_p12 }
  0x2b   : > { %1556 = shalt.err (!%p1553_p10)
}
  0x2c   : > { %1434 = dma.hbm_to_vmem [thread:$0]  (!%p1774_p13), %s2005_s1, 64, %s320_s15, [#allocation3]  }
  0x2d   : > { %p2030_p0 = scmp.ne.s32.totalorder %s2027_s12, 0 }
  0x2e   : > { %p2031_p2 = scmp.ne.s32.totalorder (!%p2030_p0), %s2028_s13, 0 }
  0x2f   : > { %372 = sbr.rel (%p2030_p0) target bundleno = 1179 (0x49b), region = 64 }
  0x36   : > { %1610 = dma.done.wait (%p2031_p2), [#allocation3], 64  }
  0x37   : > { %1612 = vsyncadd (%p2031_p2), [#allocation3], 4294967232  ;;  %p416_p4 = scmp.lt.s32.totalorder %s1631_s20, 1  ;;  %v1642_v0 = vmov 1   ;;  %v1643_v1 = vmov 0   ;;  %v1644_v4 = vmov 2  }
  0x38   : > { %1496 = vset.pattern.permute.xlu1 %v1642_v0  ;;  %1495 = vset.pattern.permute.xlu0 %v1643_v1  ;;  %v1509_v8 = vld [vmem:[%s2007_s3] sm:$0xff]   ;;  %v1510_v9 = vld [vmem:[%s2007_s3 + $0x8] sm:$0xff]   ;;  %v1511_v11 = vld [vmem:[%s2007_s3 + $0x10] sm:$0xff]   ;;  %vm664_vm0 = vcmask 523264   ;;  %s1313_s14 = sshll.u32 %s1631_s20, 4  ;;  %p2032_p10 = scmp.ne.s32.totalorder %s2024_s27, 0 }
  0x39   : > { %s417_s21 = scalar_select %p416_p4, %s1631_s20, 1  ;;  %1353 = vmatprep.subr.bf16.mxu0 %v1509_v8  ;;  %v1512_v13 = vld [vmem:[%s2007_s3 + $0x18] sm:$0xff]   ;;  %v1513_v15 = vld [vmem:[%s2009_s5] sm:$0xff]   ;;  %v1514_v16 = vld [vmem:[%s2009_s5 + $0x8] sm:$0xff]  }
  0x3a   : > { %1354 = vmatpush3.bf16.msra.mxu0 %v1509_v8  ;;  %1369 = vmatprep.subr.bf16.mxu1 %v1513_v15  ;;  %v1833_v22 = vld [vmem:[#allocation2] ss:$0 sm:$0xff]  ;;  %v1835_v24 = vld [vmem:[#allocation2 + $0x1] ss:$0 sm:$0xff]  ;;  %v1837_v25 = vld [vmem:[#allocation2 + $0x2] ss:$0 sm:$0xff] }
  0x3b   : > { %s1316_s30 = sshll.u32 %s417_s21, 6  ;;  %1355 = vmatprep.subr.bf16.mxu0 %v1510_v9  ;;  %1370 = vmatpush3.bf16.msra.mxu1 %v1513_v15  ;;  %v1847_v37 = vld [vmem:[%s2006_s2] ss:$0 sm:$0xff]  ;;  %s1646_s20 = smov [#allocation5]  }
  0x3c   : > { %s1805_s12 = scalar_lea.vmem %s2004_s0, %s1316_s30  ;;  %1371 = vmatprep.subr.bf16.mxu1 %v1514_v16  ;;  %s1954_s30 = scalar_lea.hbm %s2015_s11, %s1313_s14 }
  0x3d   : > { %v431_v2 = vld [vmem:[%s1805_s12] sm:$0xff]  ;;  %v432_v3 = vld [vmem:[%s1805_s12 + $0x8] sm:$0xff]  ;;  %v434_v5 = vld [vmem:[%s1805_s12 + $0x18] sm:$0xff]  ;;  %s1561_s13 = sshll.u32 %s1646_s20, 4  ;;  %s1562_s13 = int_to_ptr.vmem [resolvable:$false] %s1561_s13 }
  0x3e   : > { %494 = vperm.xlu1 %1496, %v431_v2   ;;  %442 = vperm.xlu0 %1495, %v431_v2   ;;  %v433_v6 = vld [vmem:[%s1805_s12 + $0x10] sm:$0xff]  ;;  %v435_v7 = vld [vmem:[%s1805_s12 + $0x20] sm:$0xff]  ;;  %v436_v10 = vld [vmem:[%s1805_s12 + $0x28] sm:$0xff]  ;;  %s1563_s28 = scalar_lea.vmem %s1562_s13, 32 }
  0x3f   : > { %1356 = vmatpush3.bf16.msra.mxu0 %v1510_v9  ;;  %v437_v12 = vld [vmem:[%s1805_s12 + $0x30] sm:$0xff]  ;;  %v438_v14 = vld [vmem:[%s1805_s12 + $0x38] sm:$0xff]  ;;  %1372 = vmatpush3.bf16.msra.mxu1 %v1514_v16  ;;  %s413_s12 = sand.u32 1, %s1623_s18  }
  0x40   : > { %1357 = vmatprep.subr.bf16.mxu0 %v1511_v11  ;;  %s1942_s26 = scalar_lea.vmem [#allocation5], %s413_s12  ;;  %s1171_s16 = scalar_lea.sflag [#allocation4], %s413_s12 }
  0x41   : > { %s1183_s25 = sshll.u32 %s1942_s26, 4  ;;  %s1956_s25 = int_to_ptr.vmem [resolvable:$true] %s1183_s25 }
  0x42   : > { %498 = vperm.xlu1 %1496, %v432_v3   ;;  %1500 = vset.pattern.permute.xlu0 %v1644_v4  ;;  %s1557_s15 = scalar_lea.vmem %s1956_s25, 16  ;;  %p1564_p1 = scmp.lt.s32.totalorder %s1956_s25, %s1562_s13 }
  0x43   : > { %551 = vperm.xlu0 %1500, %v432_v3   ;;  %1358 = vmatpush3.bf16.msra.mxu0 %v1511_v11  ;;  %p1558_p8 = scmp.ne.s32.totalorder %s1956_s25, %s1557_s15  ;;  %p1565_p3 = scmp.lt.s32.totalorder %s1563_s28, %s1557_s15 }
  0x44   : > { %1359 = vmatprep.subr.bf16.mxu0 %v1512_v13 }
  0x45   : > { %p1559_p11 = pnand %p1558_p8, %p2032_p10  ;;  %p1566_p5 = por %p1565_p3, %p1564_p1 }
  0x46   : > { %1497 = vset.pattern.permute.xlu1 %v1643_v1 }
  0x47   : > { %457 = vperm.xlu1 %1497, %v434_v5   ;;  %1501 = vset.pattern.permute.xlu0 %v1643_v1  ;;  %p1560_p13 = pneg %p1559_p11 }
  0x48   : > { %447 = vperm.xlu0 %1501, %v432_v3   ;;  %1360 = vmatpush3.bf16.msra.mxu0 %v1512_v13 }
  0x49   : > { %p1567_p6 = pnand %p1566_p5, %p1560_p13 }
  0x4b   : > { %1498 = vset.pattern.permute.xlu1 %v1642_v0 }
  0x4c   : > { %506 = vperm.xlu1 %1498, %v434_v5   ;;  %452 = vperm.xlu0 %1501, %v433_v6  }
  0x50   : > { %1499 = vset.pattern.permute.xlu1 %v1644_v4  ;;  %462 = vperm.xlu0 %1501, %v435_v7  }
  0x51   : > { %547 = vperm.xlu1 %1499, %v431_v2  }
  0x54   : > { %1502 = vset.pattern.permute.xlu0 %v1642_v0 }
  0x55   : > { %555 = vperm.xlu1 %1499, %v433_v6   ;;  %502 = vperm.xlu0 %1502, %v433_v6  }
  0x59   : > { %559 = vperm.xlu1 %1499, %v434_v5   ;;  %514 = vperm.xlu0 %1502, %v436_v10  }
  0x5d   : > { %1503 = vset.pattern.permute.xlu1 %v1643_v1  ;;  %518 = vperm.xlu0 %1502, %v437_v12  }
  0x5e   : > { %467 = vperm.xlu1 %1503, %v436_v10  }
  0x61   : > { %1507 = vset.pattern.permute.xlu0 %v1644_v4 }
  0x62   : > { %1504 = vset.pattern.permute.xlu1 %v1642_v0  ;;  %563 = vperm.xlu0 %1507, %v435_v7  }
  0x63   : > { %510 = vperm.xlu1 %1504, %v435_v7  }
  0x66   : > { %575 = vperm.xlu0 %1507, %v438_v14  }
  0x67   : > { %1505 = vset.pattern.permute.xlu1 %v1643_v1 }
  0x68   : > { %472 = vperm.xlu1 %1505, %v437_v12  }
  0x6c   : > { %477 = vperm.xlu1 %1505, %v438_v14  }
  0x70   : > { %1506 = vset.pattern.permute.xlu1 %v1642_v0 }
  0x71   : > { %522 = vperm.xlu1 %1506, %v438_v14  }
  0x75   : > { %1508 = vset.pattern.permute.xlu1 %v1644_v4 }
  0x76   : > { %567 = vperm.xlu1 %1508, %v436_v10  }
  0x7a   : > { %571 = vperm.xlu1 %1508, %v437_v12  }
  0xbd   : > { %v495_v17 = vpop.permute.xlu1 %494  ;;  %v443_v18 = vpop.permute.xlu0 %442 }
  0xbe   : > { %v529_v32 = vmul.f32 %v1835_v24, %v495_v17  ;;  %v484_v33 = vmul.f32 %v1833_v22, %v443_v18 }
  0xc0   : > { %v537_v38 = vadd.f32 %v529_v32, %v484_v33 }
  0xc1   : > { %v499_v19 = vpop.permute.xlu1 %498 }
  0xc2   : > { %v552_v20 = vpop.permute.xlu0 %551  ;;  %v530_v27 = vmul.f32 %v1835_v24, %v499_v19 }
  0xc3   : > { %v583_v28 = vmul.f32 %v1837_v25, %v552_v20 }
  0xc6   : > { %v458_v21 = vpop.permute.xlu1 %457 }
  0xc7   : > { %v448_v23 = vpop.permute.xlu0 %447  ;;  %v487_v48 = vmul.f32 %v1833_v22, %v458_v21 }
  0xc8   : > { %v485_v26 = vmul.f32 %v1833_v22, %v448_v23 }
  0xca   : > { %v538_v29 = vadd.f32 %v530_v27, %v485_v26 }
  0xcb   : > { %v507_v30 = vpop.permute.xlu1 %506  ;;  %v453_v31 = vpop.permute.xlu0 %452 }
  0xcc   : > { %v591_v34 = vadd.f32 %v583_v28, %v538_v29  ;;  %v486_v40 = vmul.f32 %v1833_v22, %v453_v31  ;;  %v532_v45 = vmul.f32 %v1835_v24, %v507_v30 }
  0xce   : > { %v606_v42 = vadd.f32 %v1847_v37, %v591_v34  ;;  %v540_v54 = vadd.f32 %v532_v45, %v487_v48  ;;  %v1277_v45 = vld [vmem:[%s2008_s4] ss:$0 sm:$0xff] }
  0xcf   : > { %v463_v35 = vpop.permute.xlu0 %462 }
  0xd0   : > { %v548_v36 = vpop.permute.xlu1 %547  ;;  %v614_v52 = vmax.f32 %v606_v42, 0.0  ;;  %v488_v8 = vmul.f32 %v1833_v22, %v463_v35 }
  0xd1   : > { %v582_v39 = vmul.f32 %v1837_v25, %v548_v36 }
  0xd3   : > { %v590_v41 = vadd.f32 %v582_v39, %v537_v38 }
  0xd4   : > { %v556_v43 = vpop.permute.xlu1 %555  ;;  %v503_v44 = vpop.permute.xlu0 %502 }
  0xd5   : > { %v531_v46 = vmul.f32 %v1835_v24, %v503_v44  ;;  %v605_v47 = vadd.f32 %v1847_v37, %v590_v41  ;;  %v584_v49 = vmul.f32 %v1837_v25, %v556_v43  ;;  %v1515_v43 = vld [vmem:[%s2009_s5 + $0x10] sm:$0xff]   ;;  %v1518_v44 = vld [vmem:[%s2011_s7 + $0x8] sm:$0xff]  }
  0xd6   : > { %1373 = vmatprep.subr.bf16.mxu1 %v1515_v43 }
  0xd7   : > { %v539_v50 = vadd.f32 %v531_v46, %v486_v40  ;;  %v613_v51 = vmax.f32 %v605_v47, 0.0  ;;  %1374 = vmatpush3.bf16.msra.mxu1 %v1515_v43 }
  0xd8   : > { %v560_v53 = vpop.permute.xlu1 %559  ;;  %v515_v1 = vpop.permute.xlu0 %514 }
  0xd9   : > { %v592_v55 = vadd.f32 %v584_v49, %v539_v50  ;;  %v585_v56 = vmul.f32 %v1837_v25, %v560_v53  ;;  %v621_v57 = vpack.c.bf16 %v614_v52, %v613_v51  ;;  %v534_v14 = vmul.f32 %v1835_v24, %v515_v1 }
  0xdb   : > { %v607_v58 = vadd.f32 %v1847_v37, %v592_v55  ;;  %v593_v59 = vadd.f32 %v585_v56, %v540_v54  ;;  %1361 = vmatprep.mubr.msk.bf16.mxu0 %vm664_vm0, %v621_v57 }
  0xdc   : > { %v519_v3 = vpop.permute.xlu0 %518 }
  0xdd   : > { %v608_v60 = vadd.f32 %v1847_v37, %v593_v59  ;;  %v468_v61 = vpop.permute.xlu1 %467  ;;  %v615_v62 = vmax.f32 %v607_v58, 0.0  ;;  %v535_v23 = vmul.f32 %v1835_v24, %v519_v3 }
  0xde   : > { %v489_v15 = vmul.f32 %v1833_v22, %v468_v61 }
  0xdf   : > { %v616_v63 = vmax.f32 %v608_v60, 0.0 }
  0xe0   : > { %v542_v21 = vadd.f32 %v534_v14, %v489_v15  ;;  %v1523_v14 = vld [vmem:[%s2013_s9 + $0x10] sm:$0xff]   ;;  %v1524_v15 = vld [vmem:[%s2013_s9 + $0x18] sm:$0xff]  }
  0xe1   : > { %v622_v0 = vpack.c.bf16 %v616_v63, %v615_v62  ;;  %v564_v7 = vpop.permute.xlu0 %563 }
  0xe2   : > { %v511_v2 = vpop.permute.xlu1 %510  ;;  %v586_v10 = vmul.f32 %v1837_v25, %v564_v7 }
  0xe3   : > { %1362 = vmatmul.mubr.msk.bf16.vlgmr.msra.gmra.mrb[0].mxu0 %vm664_vm0, %v622_v0  ;;  %v533_v6 = vmul.f32 %v1835_v24, %v511_v2 }
  0xe5   : > { %v541_v9 = vadd.f32 %v533_v6, %v488_v8  ;;  %v576_v13 = vpop.permute.xlu0 %575 }
  0xe6   : > { %v589_v19 = vmul.f32 %v1837_v25, %v576_v13  ;;  %v1522_v13 = vld [vmem:[%s2013_s9 + $0x8] sm:$0xff]  }
  0xe7   : > { %v473_v4 = vpop.permute.xlu1 %472  ;;  %v594_v17 = vadd.f32 %v586_v10, %v541_v9  ;;  %v1519_v10 = vld [vmem:[%s2011_s7 + $0x10] sm:$0xff]  }
  0xe8   : > { %v490_v26 = vmul.f32 %v1833_v22, %v473_v4 }
  0xe9   : > { %v609_v28 = vadd.f32 %v1847_v37, %v594_v17  ;;  %v1526_v17 = vld [vmem:[%s2013_s9 + $0x28] sm:$0xff]  }
  0xea   : > { %v543_v32 = vadd.f32 %v535_v23, %v490_v26 }
  0xeb   : > { %v478_v5 = vpop.permute.xlu1 %477  ;;  %v617_v35 = vmax.f32 %v609_v28, 0.0 }
  0xec   : > { %v491_v16 = vmul.f32 %v1833_v22, %v478_v5 }
  0xf0   : > { %v523_v11 = vpop.permute.xlu1 %522 }
  0xf1   : > { %v536_v12 = vmul.f32 %v1835_v24, %v523_v11  ;;  %v1520_v11 = vld [vmem:[%s2011_s7 + $0x18] sm:$0xff]  }
  0xf3   : > { %v544_v18 = vadd.f32 %v536_v12, %v491_v16  ;;  %v1521_v12 = vld [vmem:[%s2013_s9] sm:$0xff]  }
  0xf4   : > { %v1525_v16 = vld [vmem:[%s2013_s9 + $0x20] sm:$0xff]  }
  0xf5   : > { %v568_v20 = vpop.permute.xlu1 %567  ;;  %v597_v29 = vadd.f32 %v589_v19, %v544_v18  ;;  %v1286_v18 = vld [vmem:[%s2010_s6] ss:$0 sm:$0xff] }
  0xf6   : > { %v587_v27 = vmul.f32 %v1837_v25, %v568_v20 }
  0xf7   : > { %v612_v36 = vadd.f32 %v1847_v37, %v597_v29 }
  0xf8   : > { %v595_v30 = vadd.f32 %v587_v27, %v542_v21 }
  0xf9   : > { %v572_v31 = vpop.permute.xlu1 %571  ;;  %v620_v40 = vmax.f32 %v612_v36, 0.0 }
  0xfa   : > { %v610_v33 = vadd.f32 %v1847_v37, %v595_v30  ;;  %v588_v34 = vmul.f32 %v1837_v25, %v572_v31  ;;  %v1516_v25 = vld [vmem:[%s2009_s5 + $0x18] sm:$0xff]  }
  0xfb   : > { %1375 = vmatprep.subr.bf16.mxu1 %v1516_v25 }
  0xfc   : > { %v618_v38 = vmax.f32 %v610_v33, 0.0  ;;  %v596_v39 = vadd.f32 %v588_v34, %v543_v32  ;;  %1376 = vmatpush3.bf16.msra.mxu1 %v1516_v25 }
  0xfd   : > { %1401 = vmatprep.subr.bf16.mxu1 %v1521_v12 }
  0xfe   : > { %v623_v24 = vpack.c.bf16 %v618_v38, %v617_v35  ;;  %v611_v22 = vadd.f32 %v1847_v37, %v596_v39  ;;  %v1517_v37 = vld [vmem:[%s2011_s7] sm:$0xff]  }
  0xff   : > { %1385 = vmatprep.subr.bf16.mxu0 %v1517_v37 }
 0x100   : > { %v619_v41 = vmax.f32 %v611_v22, 0.0  ;;  %1365 = vmatprep.mubr.msk.bf16.mxu0 %vm664_vm0, %v623_v24  ;;  %1386 = vmatpush3.bf16.msra.mxu0 %v1517_v37 }
 0x101   : > { %1387 = vmatprep.subr.bf16.mxu0 %v1518_v44 }
 0x102   : > { %v624_v42 = vpack.c.bf16 %v620_v40, %v619_v41 }
 0x104   : > { %1366 = vmatmul.mubr.msk.bf16.gmra.mrb[4].mxu0 %vm664_vm0, %v624_v42 }
 0x105   : > { %1388 = vmatpush3.bf16.msra.mxu0 %v1518_v44 }
 0x106   : > { %1389 = vmatprep.subr.bf16.mxu0 %v1519_v10 }
 0x109   : > { %1390 = vmatpush3.bf16.msra.mxu0 %v1519_v10 }
 0x10a   : > { %1391 = vmatprep.subr.bf16.mxu0 %v1520_v11 }
 0x10d   : > { %1392 = vmatpush3.bf16.msra.mxu0 %v1520_v11 }
 0x1b6   : > { %v1363_v46 = vpop.f32.mrb[0].mxu0 }
 0x1b7   : > { %v720_v47 = vadd.f32 %v1363_v46, %v1277_v45  ;;  %v711_v48 = vpop.f32.mrb[1].mxu0 }
 0x1b8   : > { %v712_v49 = vadd.f32 %v1277_v45, %v711_v48  ;;  %v1364_v50 = vpop.f32.mrb[2].mxu0  ;;  %v1528_v48 = vld [vmem:[%s2013_s9 + $0x38] sm:$0xff]  }
 0x1b9   : > { %v723_v51 = vadd.f32 %v1364_v50, %v1277_v45  ;;  %v714_v52 = vpop.f32.mrb[3].mxu0  ;;  %v744_v54 = vmax.f32 %v720_v47, 0.0  ;;  %v1527_v47 = vld [vmem:[%s2013_s9 + $0x30] sm:$0xff]  }
 0x1ba   : > { %v715_v53 = vadd.f32 %v1277_v45, %v714_v52  ;;  %v742_v56 = vmax.f32 %v712_v49, 0.0  ;;  %v1295_v49 = vld [vmem:[%s2012_s8] ss:$0 sm:$0xff] }
 0x1bb   : > { %v745_v55 = vmax.f32 %v723_v51, 0.0 }
 0x1bc   : > { %v743_v57 = vmax.f32 %v715_v53, 0.0 }
 0x1bd   : > { %v751_v58 = vpack.c.bf16 %v745_v55, %v744_v54 }
 0x1be   : > { %v750_v59 = vpack.c.bf16 %v743_v57, %v742_v56 }
 0x1c0   : > { %1377 = vmatprep.mubr.msk.bf16.mxu1 %vm664_vm0, %v750_v59 }
 0x1c1   : > { %1378 = vmatmul.mubr.msk.bf16.vlgmr.msra.gmra.mrb[0].mxu1 %vm664_vm0, %v751_v58 }
 0x1c2   : > { %1402 = vmatpush3.bf16.msra.mxu1 %v1521_v12 }
 0x1c3   : > { %1403 = vmatprep.subr.bf16.mxu1 %v1522_v13 }
 0x1c6   : > { %1404 = vmatpush3.bf16.msra.mxu1 %v1522_v13 }
 0x1c7   : > { %1405 = vmatprep.subr.bf16.mxu1 %v1523_v14 }
 0x1ca   : > { %1406 = vmatpush3.bf16.msra.mxu1 %v1523_v14  ;;  %v1645_v14 = vmov 0.0  }
 0x1cb   : > { %1407 = vmatprep.subr.bf16.mxu1 %v1524_v15  ;;  %430 = vst [vmem:[%s1942_s26] sm:$0x1] %v1645_v14 }
 0x1ce   : > { %1408 = vmatpush3.bf16.msra.mxu1 %v1524_v15 }
 0x1cf   : > { %1409 = vmatprep.subr.bf16.mxu1 %v1525_v16 }
 0x1d2   : > { %1410 = vmatpush3.bf16.msra.mxu1 %v1525_v16 }
 0x1d3   : > { %1411 = vmatprep.subr.bf16.mxu1 %v1526_v17 }
 0x1d6   : > { %1412 = vmatpush3.bf16.msra.mxu1 %v1526_v17 }
 0x1d7   : > { %v1367_v60 = vpop.f32.mrb[4].mxu0  ;;  %1413 = vmatprep.subr.bf16.mxu1 %v1527_v47 }
 0x1d8   : > { %v736_v61 = vadd.f32 %v1367_v60, %v1277_v45  ;;  %v727_v62 = vpop.f32.mrb[5].mxu0 }
 0x1d9   : > { %v728_v63 = vadd.f32 %v1277_v45, %v727_v62  ;;  %v1368_v0 = vpop.f32.mrb[6].mxu0 }
 0x1da   : > { %v739_v1 = vadd.f32 %v1368_v0, %v1277_v45  ;;  %v730_v2 = vpop.f32.mrb[7].mxu0  ;;  %v748_v4 = vmax.f32 %v736_v61, 0.0  ;;  %1414 = vmatpush3.bf16.msra.mxu1 %v1527_v47 }
 0x1db   : > { %v731_v3 = vadd.f32 %v1277_v45, %v730_v2  ;;  %v746_v6 = vmax.f32 %v728_v63, 0.0  ;;  %1415 = vmatprep.subr.bf16.mxu1 %v1528_v48 }
 0x1dc   : > { %v749_v5 = vmax.f32 %v739_v1, 0.0 }
 0x1dd   : > { %v747_v7 = vmax.f32 %v731_v3, 0.0 }
 0x1de   : > { %v753_v8 = vpack.c.bf16 %v749_v5, %v748_v4  ;;  %1416 = vmatpush3.bf16.msra.mxu1 %v1528_v48 }
 0x1df   : > { %v752_v9 = vpack.c.bf16 %v747_v7, %v746_v6 }
 0x1e1   : > { %1381 = vmatprep.mubr.msk.bf16.mxu1 %vm664_vm0, %v752_v9 }
 0x1e2   : > { %1382 = vmatmul.mubr.msk.bf16.gmra.mrb[4].mxu1 %vm664_vm0, %v753_v8 }
 0x294   : > { %v1379_v19 = vpop.f32.mrb[0].mxu1 }
 0x295   : > { %v848_v20 = vadd.f32 %v1379_v19, %v1286_v18  ;;  %v839_v21 = vpop.f32.mrb[1].mxu1  ;;  %v1304_v19 = vld [vmem:[%s2014_s10] ss:$0 sm:$0xff] }
 0x296   : > { %v840_v23 = vadd.f32 %v1286_v18, %v839_v21  ;;  %v1380_v26 = vpop.f32.mrb[2].mxu1 }
 0x297   : > { %v851_v27 = vadd.f32 %v1380_v26, %v1286_v18  ;;  %v842_v28 = vpop.f32.mrb[3].mxu1  ;;  %v872_v30 = vmax.f32 %v848_v20, 0.0 }
 0x298   : > { %v843_v29 = vadd.f32 %v1286_v18, %v842_v28  ;;  %v870_v32 = vmax.f32 %v840_v23, 0.0 }
 0x299   : > { %v873_v31 = vmax.f32 %v851_v27, 0.0 }
 0x29a   : > { %v871_v33 = vmax.f32 %v843_v29, 0.0 }
 0x29b   : > { %v879_v34 = vpack.c.bf16 %v873_v31, %v872_v30 }
 0x29c   : > { %v878_v35 = vpack.c.bf16 %v871_v33, %v870_v32 }
 0x29e   : > { %1393 = vmatprep.mubr.msk.bf16.mxu0 %vm664_vm0, %v878_v35 }
 0x29f   : > { %1394 = vmatmul.mubr.msk.bf16.vlgmr.msra.gmra.mrb[8].mxu0 %vm664_vm0, %v879_v34 }
 0x2b5   : > { %v1383_v36 = vpop.f32.mrb[4].mxu1 }
 0x2b6   : > { %v864_v38 = vadd.f32 %v1383_v36, %v1286_v18  ;;  %v855_v39 = vpop.f32.mrb[5].mxu1 }
 0x2b7   : > { %v856_v24 = vadd.f32 %v1286_v18, %v855_v39  ;;  %v1384_v22 = vpop.f32.mrb[6].mxu1 }
 0x2b8   : > { %v867_v40 = vadd.f32 %v1384_v22, %v1286_v18  ;;  %v858_v41 = vpop.f32.mrb[7].mxu1  ;;  %v876_v43 = vmax.f32 %v864_v38, 0.0 }
 0x2b9   : > { %v859_v42 = vadd.f32 %v1286_v18, %v858_v41  ;;  %v874_v37 = vmax.f32 %v856_v24, 0.0 }
 0x2ba   : > { %v877_v25 = vmax.f32 %v867_v40, 0.0 }
 0x2bb   : > { %v875_v44 = vmax.f32 %v859_v42, 0.0 }
 0x2bc   : > { %v881_v45 = vpack.c.bf16 %v877_v25, %v876_v43 }
 0x2bd   : > { %v880_v46 = vpack.c.bf16 %v875_v44, %v874_v37 }
 0x2bf   : > { %1397 = vmatprep.mubr.msk.bf16.mxu0 %vm664_vm0, %v880_v46 }
 0x2c0   : > { %1398 = vmatmul.mubr.msk.bf16.gmra.mrb[12].mxu0 %vm664_vm0, %v881_v45 }
 0x372   : > { %v1395_v50 = vpop.f32.mrb[8].mxu0 }
 0x373   : > { %v976_v51 = vadd.f32 %v1395_v50, %v1295_v49  ;;  %v967_v52 = vpop.f32.mrb[9].mxu0 }
 0x374   : > { %v968_v53 = vadd.f32 %v1295_v49, %v967_v52  ;;  %v1396_v54 = vpop.f32.mrb[10].mxu0  ;;  %v1167_v52 = vld [vmem:[%s1942_s26] sm:$0x1] }
 0x375   : > { %v979_v55 = vadd.f32 %v1396_v54, %v1295_v49  ;;  %v970_v56 = vpop.f32.mrb[11].mxu0  ;;  %v1000_v58 = vmax.f32 %v976_v51, 0.0 }
 0x376   : > { %v971_v57 = vadd.f32 %v1295_v49, %v970_v56  ;;  %v998_v60 = vmax.f32 %v968_v53, 0.0 }
 0x377   : > { %v1001_v59 = vmax.f32 %v979_v55, 0.0 }
 0x378   : > { %v999_v61 = vmax.f32 %v971_v57, 0.0 }
 0x379   : > { %v1007_v62 = vpack.c.bf16 %v1001_v59, %v1000_v58 }
 0x37a   : > { %v1006_v63 = vpack.c.bf16 %v999_v61, %v998_v60 }
 0x37c   : > { %1417 = vmatprep.mubr.bf16.mxu1 %v1006_v63 }
 0x37d   : > { %1418 = vmatmul.mubr.bf16.vlgmr.msra.gmra.mrb[8].mxu1 %v1007_v62 }
 0x393   : > { %v1399_v0 = vpop.f32.mrb[12].mxu0 }
 0x394   : > { %v992_v1 = vadd.f32 %v1399_v0, %v1295_v49  ;;  %v983_v2 = vpop.f32.mrb[13].mxu0 }
 0x395   : > { %v984_v3 = vadd.f32 %v1295_v49, %v983_v2  ;;  %v1400_v4 = vpop.f32.mrb[14].mxu0 }
 0x396   : > { %v995_v5 = vadd.f32 %v1400_v4, %v1295_v49  ;;  %v986_v6 = vpop.f32.mrb[15].mxu0  ;;  %v1004_v8 = vmax.f32 %v992_v1, 0.0 }
 0x397   : > { %v987_v7 = vadd.f32 %v1295_v49, %v986_v6  ;;  %v1002_v10 = vmax.f32 %v984_v3, 0.0 }
 0x398   : > { %v1005_v9 = vmax.f32 %v995_v5, 0.0 }
 0x399   : > { %v1003_v11 = vmax.f32 %v987_v7, 0.0 }
 0x39a   : > { %v1009_v12 = vpack.c.bf16 %v1005_v9, %v1004_v8 }
 0x39b   : > { %v1008_v13 = vpack.c.bf16 %v1003_v11, %v1002_v10 }
 0x39d   : > { %1421 = vmatprep.mubr.bf16.mxu1 %v1008_v13 }
 0x39e   : > { %1422 = vmatmul.mubr.bf16.gmra.mrb[12].mxu1 %v1009_v12 }
 0x450   : > { %v1419_v15 = vpop.f32.mrb[8].mxu1 }
 0x451   : > { %v1115_v16 = vpop.f32.mrb[9].mxu1  ;;  %v1124_v20 = vadd.f32 %v1419_v15, %v1304_v19 }
 0x452   : > { %v1420_v17 = vpop.f32.mrb[10].mxu1  ;;  %v1116_v21 = vadd.f32 %v1304_v19, %v1115_v16 }
 0x453   : > { %v1118_v18 = vpop.f32.mrb[11].mxu1  ;;  %v1127_v26 = vadd.f32 %v1420_v17, %v1304_v19  ;;  %v1148_v32 = vmax.f32 %v1124_v20, 0.0 }
 0x454   : > { %v1119_v29 = vadd.f32 %v1304_v19, %v1118_v18  ;;  %v1146_v36 = vmax.f32 %v1116_v21, 0.0 }
 0x455   : > { %v1149_v24 = vmax.f32 %v1127_v26, 0.0 }
 0x456   : > { %v1147_v41 = vmax.f32 %v1119_v29, 0.0 }
 0x471   : > { %v1423_v23 = vpop.f32.mrb[12].mxu1 }
 0x472   : > { %v1140_v27 = vadd.f32 %v1423_v23, %v1304_v19  ;;  %v1131_v28 = vpop.f32.mrb[13].mxu1 }
 0x473   : > { %v1132_v30 = vadd.f32 %v1304_v19, %v1131_v28  ;;  %v1424_v31 = vpop.f32.mrb[14].mxu1 }
 0x474   : > { %v1152_v33 = vmax.f32 %v1140_v27, 0.0  ;;  %v1143_v34 = vadd.f32 %v1424_v31, %v1304_v19  ;;  %v1134_v35 = vpop.f32.mrb[15].mxu1 }
 0x475   : > { %v1150_v38 = vmax.f32 %v1132_v30, 0.0  ;;  %v1135_v39 = vadd.f32 %v1304_v19, %v1134_v35 }
 0x476   : > { %v1156_v22 = vmax.f32 %v1148_v32, %v1152_v33  ;;  %v1153_v40 = vmax.f32 %v1143_v34, 0.0 }
 0x477   : > { %v1154_v42 = vmax.f32 %v1146_v36, %v1150_v38  ;;  %v1151_v43 = vmax.f32 %v1135_v39, 0.0 }
 0x478   : > { %v1157_v25 = vmax.f32 %v1149_v24, %v1153_v40 }
 0x479   : > { %v1155_v37 = vmax.f32 %v1147_v41, %v1151_v43 }
 0x47a   : > { %v1159_v44 = vmax.f32 %v1156_v22, %v1157_v25 }
 0x47b   : > { %v1158_v45 = vmax.f32 %v1154_v42, %v1155_v37 }
 0x47d   : > { %v1160_v46 = vmax.f32 %v1158_v45, %v1159_v44 }
 0x47f   : > { %v1161_v47 = vrot.slane %v1160_v46, 4 }
 0x481   : > { %v1162_v48 = vmax.f32 %v1160_v46, %v1161_v47 }
 0x483   : > { %v1163_v49 = vrot.slane %v1162_v48, 2 }
 0x485   : > { %v1164_v50 = vmax.f32 %v1162_v48, %v1163_v49 }
 0x487   : > { %v1165_v51 = vrot.slane %v1164_v50, 1 }
 0x489   : > { %v1166_v53 = vmax.f32 %v1164_v50, %v1165_v51 }
 0x48b   : > { %v1168_v54 = vmax.f32 %v1167_v52, %v1166_v53 }
 0x48d   : > { %1169 = vst [vmem:[%s1942_s26] sm:$0x1] %v1168_v54 }
 0x48e   : > { %1570 = shalt.err (!%p1567_p6)
}
 0x48f   : > { %s1571_s12 = scalar_lea.hbm %s1954_s30, 16  ;;  %s1575_s14 = scalar_lea.hbm %s2015_s11, 32 }
 0x490   : > { %p1572_p7 = scmp.ne.s32.totalorder %s1954_s30, %s1571_s12  ;;  %p1576_p0 = scmp.lt.u32.totalorder %s1954_s30, %s2015_s11 }
 0x491   : > { %p1577_p2 = scmp.lt.u32.totalorder %s1575_s14, %s1571_s12  ;;  %p1579_p8 = scmp.lt.u32.totalorder %s1571_s12, %s1954_s30 }
 0x492   : > { %p1573_p9 = pnand %p1572_p7, %p2032_p10 }
 0x493   : > { %p1578_p4 = por %p1577_p2, %p1576_p0 }
 0x494   : > { %p1574_p12 = pneg %p1573_p9 }
 0x495   : > { %p1580_p11 = por %p1579_p8, %p1578_p4 }
 0x497   : > { %p1581_p13 = pnand %p1580_p11, %p1574_p12 }
 0x499   : > { %1584 = shalt.err (!%p1581_p13)
}
 0x49a   : > { %1429 = dma.vmem_to_hbm [thread:$0]  (%p2032_p10), %s1956_s25, 16, %s1954_s30, %s1171_s16  }
 0x49b PF: > { %p1441_p1 = scmp.ge.s32.totalorder %s1639_s22, 2  ;;  %s1195_s15 = sand.u32 1, %s1619_s17  }
 0x49c   : > { %p2033_p3 = scmp.ne.s32.totalorder %s2025_s29, 0  ;;  %s1196_s20 = scalar_lea.sflag [#allocation4], %s1195_s15 }
 0x49e   : > { %p1436_p5 = pnand %p1441_p1, %p2033_p3 }
 0x4a0   : > { %1614 = dma.done.wait (!%p1436_p5), %s1196_s20, 16  }
 0x4a1   : > { %1616 = vsyncadd (!%p1436_p5), %s1196_s20, 4294967280  ;;  %s25_s22 = sadd.s32 1, %s1639_s22   ;;  %s2034_s27 = sld [smem:[#allocation10_spill]] }
 0x4a2   : > { %p22_p6 = scmp.ge.s32.totalorder %s25_s22, 4   ;;  %s2035_s20 = sld [smem:[#allocation8_spill]] }
 0x4a3   : > { %s2036_s21 = sld [smem:[#allocation9_spill]]  ;;  %s2037_s17 = smov %s1623_s18 }
 0x4a4   : > { %s2038_s18 = smov %s1627_s19  ;;  %24 = sbr.rel (!%p22_p6) target bundleno = 5 (0x5), region = 108 }
 0x4a7   : > { %s2039_s19 = smov %s2034_s27 }
 0x4ab   :  { %1200 = vsyncpa [#allocation3], 1 }
 0x4ac   :  { %1202 = vsyncpa [#allocation3 + $0x1], 1 }
 0x4ad   :  { %1203 = vsyncpa [#allocation4], 1 }
 0x4ae   :  { %1205 = vsyncpa [#allocation4 + $0x1], 1 }

</bundles_post_ra>
